<compile_context>
chip_gen: v7x
topology: tpu7x:2x2x1
jax: 0.10.0
libtpu: 0.0.40
codegen_flags: <defaults>
</compile_context>

<pallas_src>
import math

import jax
import jax.numpy as jnp
from jax.experimental import pallas as pl
from jax.experimental.pallas import tpu as pltpu  # noqa: F401

# ----- model dims (small, consistent with the module's structure) -----
BATCH = 2
SEQ = 8
HIDDEN = 32
NUM_HEADS = 4
HEAD_SIZE = HIDDEN // NUM_HEADS
INTERMEDIATE = 64
LN_EPS = 1e-12
NEG_BIG = -1e9          # cross-batch "never attend" additive value (exp underflows to 0)

BS = BATCH * SEQ        # 16 flattened token rows

# ----- packed parameter-slab layout (all blocks start at lane 0, 8-aligned rows) -----
SLAB_COLS = 3 * HIDDEN                      # 96
ROW_WQKV = 0                                # (HIDDEN, 3*HIDDEN) fused Q|K|V, Q pre-scaled
ROW_WI = ROW_WQKV + HIDDEN                  # (HIDDEN, INTERMEDIATE)
ROW_WO = ROW_WI + HIDDEN                    # (INTERMEDIATE, HIDDEN)
ROW_SEL = ROW_WO + INTERMEDIATE             # (NUM_HEADS*BS, HIDDEN) 0/1 head selection
ROW_VEC = ROW_SEL + NUM_HEADS * BS          # 8 rows of 1-row vectors
SLAB_ROWS = ROW_VEC + 8                     # 200


def _layernorm(z, gamma, beta):
    # two independent cross-lane reductions (E[z], E[z*z]) instead of the serial
    # mean -> subtract -> square -> mean chain; matches PyTorch's biased variance.
    mu = jnp.mean(z, axis=-1, keepdims=True)
    ms = jnp.mean(z * z, axis=-1, keepdims=True)
    var = ms - mu * mu
    return (z - mu) * jax.lax.rsqrt(var + LN_EPS) * gamma + beta


def transformer_block_kernel(x_ref, bias_ref, p_ref, o_ref):
    x = x_ref[...]                                                  # (16, 32)
    bias = bias_ref[...]                                            # (16, 64)

    # --- static, tile-aligned slices of the single packed parameter slab ---
    w_qkv = p_ref[ROW_WQKV:ROW_WQKV + HIDDEN, :]                    # (32, 96)
    w_i = p_ref[ROW_WI:ROW_WI + HIDDEN, 0:INTERMEDIATE]             # (32, 64)
    w_o = p_ref[ROW_WO:ROW_WO + INTERMEDIATE, 0:HIDDEN]             # (64, 32)
    sel = p_ref[ROW_SEL:ROW_SEL + NUM_HEADS * BS, 0:HIDDEN]         # (64, 32)
    vecs = p_ref[ROW_VEC:ROW_VEC + 8, :]                            # (8, 96)
    b_qkv = vecs[0:1, :]                                            # (1, 96)
    b_i = vecs[1:2, 0:INTERMEDIATE]
    b_o = vecs[2:3, 0:HIDDEN]
    g1 = vecs[3:4, 0:HIDDEN]
    be1 = vecs[4:5, 0:HIDDEN]
    g2 = vecs[5:6, 0:HIDDEN]
    be2 = vecs[6:7, 0:HIDDEN]

    # fused Q|K|V projection; 1/sqrt(head_size) already folded into the Q weights/bias
    qkv = jnp.dot(x, w_qkv, preferred_element_type=jnp.float32) + b_qkv   # (16, 96)
    q = qkv[:, 0:HIDDEN]
    k = qkv[:, HIDDEN:2 * HIDDEN]
    v = qkv[:, 2 * HIDDEN:3 * HIDDEN]

    # Head-stacked ("block-diagonal") K and V: replicate once per head along the
    # sublane axis and zero out channels not owned by that head (sel is a constant).
    k_bd = jnp.concatenate([k, k, k, k], axis=0) * sel              # (64, 32)
    v_bd = jnp.concatenate([v, v, v, v], axis=0) * sel              # (64, 32)

    # All heads' scores in ONE MXU push: column block h*16..(h+1)*16 of `s` is
    # Q_h @ K_h^T.  `bias` already carries key padding + cross-batch -1e9, per head.
    s = jax.lax.dot_general(q, k_bd, (((1,), (1,)), ((), ())),
                            preferred_element_type=jnp.float32) + bias    # (16, 64)

    # softmax per 16-lane head segment; shift by the per-row global max
    # (shift-invariant, and scores here are O(1), so no per-segment max is needed)
    m = jnp.max(s, axis=-1, keepdims=True)
    p = jnp.exp(s - m)                                              # (16, 64)

    # one push gives every head's softmax denominator already broadcast across that
    # head's 8 output channels; one push gives every head's context vectors landing
    # directly in their final channel positions (no per-head loop, no concatenate)
    denom = jnp.dot(p, sel, preferred_element_type=jnp.float32)     # (16, 32)
    ctx = jnp.dot(p, v_bd, preferred_element_type=jnp.float32)      # (16, 32)
    attn = ctx / denom
    # TODO(synk): attention-probs / hidden dropout omitted (inference/eval semantics).

    # residual + LayerNorm1
    y1 = _layernorm(attn + x, g1, be1)

    # feed-forward (the reference module has NO activation between the two linears)
    inter = jnp.dot(y1, w_i, preferred_element_type=jnp.float32) + b_i    # (16, 64)
    ff = jnp.dot(inter, w_o, preferred_element_type=jnp.float32) + b_o    # (16, 32)

    # residual + LayerNorm2
    o_ref[...] = _layernorm(ff + y1, g2, be2)


def pack_params(params):
    """One-time host-side parameter transform: fuse QKV, fold in 1/sqrt(d), and pack
    every weight/bias/LN tensor plus the constant head-selection matrix into a single
    f32 slab (one DMA instead of ~12)."""
    inv = 1.0 / math.sqrt(HEAD_SIZE)
    w_qkv = jnp.concatenate([params["wq"] * inv, params["wk"], params["wv"]], axis=1)
    b_qkv = jnp.concatenate([params["bq"] * inv, params["bk"], params["bv"]], axis=1)

    # sel[h*BS + t, c] = 1 iff channel c belongs to head h
    head_of_row = jnp.arange(NUM_HEADS * BS)[:, None] // BS
    head_of_col = jnp.arange(HIDDEN)[None, :] // HEAD_SIZE
    sel = (head_of_row == head_of_col).astype(jnp.float32)                 # (64, 32)

    slab = jnp.zeros((SLAB_ROWS, SLAB_COLS), jnp.float32)
    slab = slab.at[ROW_WQKV:ROW_WQKV + HIDDEN, :].set(w_qkv)
    slab = slab.at[ROW_WI:ROW_WI + HIDDEN, 0:INTERMEDIATE].set(params["wi"])
    slab = slab.at[ROW_WO:ROW_WO + INTERMEDIATE, 0:HIDDEN].set(params["wo"])
    slab = slab.at[ROW_SEL:ROW_SEL + NUM_HEADS * BS, 0:HIDDEN].set(sel)
    slab = slab.at[ROW_VEC + 0, 0:3 * HIDDEN].set(b_qkv[0])
    slab = slab.at[ROW_VEC + 1, 0:INTERMEDIATE].set(params["bi"][0])
    slab = slab.at[ROW_VEC + 2, 0:HIDDEN].set(params["bo"][0])
    slab = slab.at[ROW_VEC + 3, 0:HIDDEN].set(params["g1"][0])
    slab = slab.at[ROW_VEC + 4, 0:HIDDEN].set(params["be1"][0])
    slab = slab.at[ROW_VEC + 5, 0:HIDDEN].set(params["g2"][0])
    slab = slab.at[ROW_VEC + 6, 0:HIDDEN].set(params["be2"][0])
    return slab


def build_attention_bias(mask_add):
    """(B, S) additive key mask -> (B*S, NUM_HEADS*B*S) additive score bias with a
    block-diagonal -1e9 term forbidding cross-batch attention, tiled across heads."""
    key_mask = mask_add.reshape(1, BS)                                      # (1, 16)
    row_b = jnp.arange(BS)[:, None] // SEQ
    col_b = jnp.arange(BS)[None, :] // SEQ
    block = jnp.where(row_b == col_b, 0.0, NEG_BIG)
    full = key_mask + block                                                 # (16, 16)
    return jnp.tile(full, (1, NUM_HEADS)).astype(jnp.float32)               # (16, 64)


def transformer_block(x, mask_add, param_slab):
    """x: (B, S, H) f32; mask_add: (B, S) additive key mask (0 / -10000)."""
    B, S, H = x.shape
    x2 = x.reshape(B * S, H)                 # (16, 32): no cross-tile relayout needed
    bias = build_attention_bias(mask_add)    # (16, 64)
    out = pl.pallas_call(
        transformer_block_kernel,
        out_shape=jax.ShapeDtypeStruct((B * S, H), jnp.float32),
        # TODO(synk): at real (larger) shapes, add a token-tile grid axis marked
        # "parallel" so both v7x TensorCores get work; pointless at B*S = 16.
    )(x2, bias, param_slab)
    return out.reshape(B, S, H)


def init_params(key):
    ks = jax.random.split(key, 8)
    init = 0.02
    return {
        "wq": jax.random.normal(ks[0], (HIDDEN, HIDDEN), jnp.float32) * init,
        "bq": jnp.zeros((1, HIDDEN), jnp.float32),
        "wk": jax.random.normal(ks[1], (HIDDEN, HIDDEN), jnp.float32) * init,
        "bk": jnp.zeros((1, HIDDEN), jnp.float32),
        "wv": jax.random.normal(ks[2], (HIDDEN, HIDDEN), jnp.float32) * init,
        "bv": jnp.zeros((1, HIDDEN), jnp.float32),
        "g1": jnp.ones((1, HIDDEN), jnp.float32),
        "be1": jnp.zeros((1, HIDDEN), jnp.float32),
        "wi": jax.random.normal(ks[3], (HIDDEN, INTERMEDIATE), jnp.float32) * init,
        "bi": jnp.zeros((1, INTERMEDIATE), jnp.float32),
        "wo": jax.random.normal(ks[4], (INTERMEDIATE, HIDDEN), jnp.float32) * init,
        "bo": jnp.zeros((1, HIDDEN), jnp.float32),
        "g2": jnp.ones((1, HIDDEN), jnp.float32),
        "be2": jnp.zeros((1, HIDDEN), jnp.float32),
    }


def _layernorm_ref(z, gamma, beta):
    mu = jnp.mean(z, axis=-1, keepdims=True)
    var = jnp.mean((z - mu) ** 2, axis=-1, keepdims=True)
    return (z - mu) * jax.lax.rsqrt(var + LN_EPS) * gamma + beta


def reference(x, mask_add, p):
    """Pure-JAX reference mirroring the PyTorch forward (eval mode)."""
    B, S, H = x.shape
    q = x @ p["wq"] + p["bq"][0]
    k = x @ p["wk"] + p["bk"][0]
    v = x @ p["wv"] + p["bv"][0]

    def split(t):
        return t.reshape(B, S, NUM_HEADS, HEAD_SIZE).transpose(0, 2, 1, 3)

    qh, kh, vh = split(q), split(k), split(v)
    scores = jnp.einsum("bhqd,bhkd->bhqk", qh, kh) / math.sqrt(HEAD_SIZE)
    scores = scores + mask_add[:, None, None, :]
    probs = jax.nn.softmax(scores, axis=-1)
    ctx = jnp.einsum("bhqk,bhkd->bhqd", probs, vh)
    attn = ctx.transpose(0, 2, 1, 3).reshape(B, S, H)
    y1 = _layernorm_ref(attn + x, p["g1"][0], p["be1"][0])
    ff = (y1 @ p["wi"] + p["bi"][0]) @ p["wo"] + p["bo"][0]
    return _layernorm_ref(ff + y1, p["g2"][0], p["be2"][0])


if __name__ == "__main__":
    key = jax.random.PRNGKey(0)
    kx, kp = jax.random.split(key)
    x = jax.random.normal(kx, (BATCH, SEQ, HIDDEN), jnp.float32)

    # additive attention mask: batch 0 has 6 valid tokens, batch 1 has all 8
    valid = jnp.array([6, 8])
    key_mask = (jnp.arange(SEQ)[None, :] < valid[:, None]).astype(jnp.float32)
    mask_add = (1.0 - key_mask) * -10000.0              # (B, S) additive key mask

    params = init_params(kp)
    param_slab = pack_params(params)                    # one-time host-side packing

    out = transformer_block(x, mask_add, param_slab)
    out = jax.block_until_ready(out)

    ref = reference(x, mask_add, params)
    assert out.shape == (BATCH, SEQ, HIDDEN)
    assert jnp.allclose(out, ref, atol=1e-4, rtol=1e-4), "mismatch vs reference"
    print("KERNEL_OK")
</pallas_src>

<mosaic_0001>
module attributes {stable_mosaic.version = 11 : i64} {
  func.func @transformer_block_kernel(%arg0: memref<16x32xf32, #tpu.memory_space<vmem>>, %arg1: memref<16x64xf32, #tpu.memory_space<vmem>>, %arg2: memref<200x96xf32, #tpu.memory_space<vmem>>, %arg3: memref<16x32xf32, #tpu.memory_space<vmem>>) attributes {dimension_semantics = [], scalar_prefetch = 0 : i64, scratch_operands = 0 : i64, tpu.core_type = #tpu.core_type<tc>} {
    %c0 = arith.constant 0 : index
    %c0_0 = arith.constant 0 : index
    %0 = vector.load %arg0[%c0, %c0_0] : memref<16x32xf32, #tpu.memory_space<vmem>>, vector<16x32xf32>
    %c0_1 = arith.constant 0 : index
    %c0_2 = arith.constant 0 : index
    %1 = vector.load %arg1[%c0_1, %c0_2] : memref<16x64xf32, #tpu.memory_space<vmem>>, vector<16x64xf32>
    %c0_3 = arith.constant 0 : index
    %c0_4 = arith.constant 0 : index
    %2 = vector.load %arg2[%c0_3, %c0_4] : memref<200x96xf32, #tpu.memory_space<vmem>>, vector<32x96xf32>
    %c32 = arith.constant 32 : index
    %c0_5 = arith.constant 0 : index
    %3 = vector.load %arg2[%c32, %c0_5] : memref<200x96xf32, #tpu.memory_space<vmem>>, vector<32x64xf32>
    %c64 = arith.constant 64 : index
    %c0_6 = arith.constant 0 : index
    %4 = vector.load %arg2[%c64, %c0_6] : memref<200x96xf32, #tpu.memory_space<vmem>>, vector<64x32xf32>
    %c128 = arith.constant 128 : index
    %c0_7 = arith.constant 0 : index
    %5 = vector.load %arg2[%c128, %c0_7] : memref<200x96xf32, #tpu.memory_space<vmem>>, vector<64x32xf32>
    %c192 = arith.constant 192 : index
    %c0_8 = arith.constant 0 : index
    %6 = vector.load %arg2[%c192, %c0_8] : memref<200x96xf32, #tpu.memory_space<vmem>>, vector<8x96xf32>
    %7 = vector.extract_strided_slice %6 {offsets = [0, 0], sizes = [1, 96], strides = [1, 1]} : vector<8x96xf32> to vector<1x96xf32>
    %8 = vector.extract_strided_slice %6 {offsets = [1, 0], sizes = [1, 64], strides = [1, 1]} : vector<8x96xf32> to vector<1x64xf32>
    %9 = vector.extract_strided_slice %6 {offsets = [2, 0], sizes = [1, 32], strides = [1, 1]} : vector<8x96xf32> to vector<1x32xf32>
    %10 = vector.extract_strided_slice %6 {offsets = [3, 0], sizes = [1, 32], strides = [1, 1]} : vector<8x96xf32> to vector<1x32xf32>
    %11 = vector.extract_strided_slice %6 {offsets = [4, 0], sizes = [1, 32], strides = [1, 1]} : vector<8x96xf32> to vector<1x32xf32>
    %12 = vector.extract_strided_slice %6 {offsets = [5, 0], sizes = [1, 32], strides = [1, 1]} : vector<8x96xf32> to vector<1x32xf32>
    %13 = vector.extract_strided_slice %6 {offsets = [6, 0], sizes = [1, 32], strides = [1, 1]} : vector<8x96xf32> to vector<1x32xf32>
    %cst = arith.constant dense<0.000000e+00> : vector<16x96xf32>
    %14 = tpu.matmul %0, %2, %cst {dimension_numbers = #tpu.dot_dimension_numbers<[1], [0], [0], [1], [0, 0, 1, 1], [], []>} : vector<16x32xf32>, vector<32x96xf32>, vector<16x96xf32> -> vector<16x96xf32>
    %15 = vector.broadcast %7 : vector<1x96xf32> to vector<16x96xf32>
    %16 = arith.addf %14, %15 : vector<16x96xf32>
    %17 = vector.extract_strided_slice %16 {offsets = [0, 0], sizes = [16, 32], strides = [1, 1]} : vector<16x96xf32> to vector<16x32xf32>
    %18 = vector.extract_strided_slice %16 {offsets = [0, 32], sizes = [16, 32], strides = [1, 1]} : vector<16x96xf32> to vector<16x32xf32>
    %19 = vector.extract_strided_slice %16 {offsets = [0, 64], sizes = [16, 32], strides = [1, 1]} : vector<16x96xf32> to vector<16x32xf32>
    %20 = tpu.concatenate %18, %18, %18, %18 in 0 : vector<16x32xf32>, vector<16x32xf32>, vector<16x32xf32>, vector<16x32xf32> -> vector<64x32xf32>
    %21 = arith.mulf %20, %5 : vector<64x32xf32>
    %22 = tpu.concatenate %19, %19, %19, %19 in 0 : vector<16x32xf32>, vector<16x32xf32>, vector<16x32xf32>, vector<16x32xf32> -> vector<64x32xf32>
    %23 = arith.mulf %22, %5 : vector<64x32xf32>
    %cst_9 = arith.constant dense<0.000000e+00> : vector<16x64xf32>
    %24 = tpu.matmul %17, %21, %cst_9 {dimension_numbers = #tpu.dot_dimension_numbers<[1], [1], [0], [0], [0, 0, 1, 0], [], []>} : vector<16x32xf32>, vector<64x32xf32>, vector<16x64xf32> -> vector<16x64xf32>
    %25 = arith.addf %24, %1 : vector<16x64xf32>
    %cst_10 = arith.constant dense<0xFF800000> : vector<16xf32>
    %26 = vector.multi_reduction <maximumf>, %25, %cst_10 [1] : vector<16x64xf32> to vector<16xf32>
    %27 = vector.shape_cast %26 : vector<16xf32> to vector<16x1xf32>
    %28 = vector.broadcast %27 : vector<16x1xf32> to vector<16x64xf32>
    %29 = arith.subf %25, %28 : vector<16x64xf32>
    %30 = math.exp %29 : vector<16x64xf32>
    %cst_11 = arith.constant dense<0.000000e+00> : vector<16x32xf32>
    %31 = tpu.matmul %30, %5, %cst_11 {dimension_numbers = #tpu.dot_dimension_numbers<[1], [0], [0], [1], [0, 0, 1, 1], [], []>} : vector<16x64xf32>, vector<64x32xf32>, vector<16x32xf32> -> vector<16x32xf32>
    %cst_12 = arith.constant dense<0.000000e+00> : vector<16x32xf32>
    %32 = tpu.matmul %30, %23, %cst_12 {dimension_numbers = #tpu.dot_dimension_numbers<[1], [0], [0], [1], [0, 0, 1, 1], [], []>} : vector<16x64xf32>, vector<64x32xf32>, vector<16x32xf32> -> vector<16x32xf32>
    %33 = arith.divf %32, %31 : vector<16x32xf32>
    %34 = arith.addf %33, %0 : vector<16x32xf32>
    %cst_13 = arith.constant dense<0.000000e+00> : vector<16xf32>
    %35 = vector.multi_reduction <add>, %34, %cst_13 [1] : vector<16x32xf32> to vector<16xf32>
    %36 = vector.shape_cast %35 : vector<16xf32> to vector<16x1xf32>
    %cst_14 = arith.constant 3.200000e+01 : f32
    %37 = vector.broadcast %cst_14 : f32 to vector<16x1xf32>
    %38 = arith.divf %36, %37 : vector<16x1xf32>
    %39 = arith.mulf %34, %34 : vector<16x32xf32>
    %cst_15 = arith.constant dense<0.000000e+00> : vector<16xf32>
    %40 = vector.multi_reduction <add>, %39, %cst_15 [1] : vector<16x32xf32> to vector<16xf32>
    %41 = vector.shape_cast %40 : vector<16xf32> to vector<16x1xf32>
    %cst_16 = arith.constant 3.200000e+01 : f32
    %42 = vector.broadcast %cst_16 : f32 to vector<16x1xf32>
    %43 = arith.divf %41, %42 : vector<16x1xf32>
    %44 = arith.mulf %38, %38 : vector<16x1xf32>
    %45 = arith.subf %43, %44 : vector<16x1xf32>
    %46 = vector.broadcast %38 : vector<16x1xf32> to vector<16x32xf32>
    %47 = arith.subf %34, %46 : vector<16x32xf32>
    %cst_17 = arith.constant 9.99999996E-13 : f32
    %48 = vector.broadcast %cst_17 : f32 to vector<16x1xf32>
    %49 = arith.addf %45, %48 : vector<16x1xf32>
    %50 = math.rsqrt %49 : vector<16x1xf32>
    %51 = vector.broadcast %50 : vector<16x1xf32> to vector<16x32xf32>
    %52 = arith.mulf %47, %51 : vector<16x32xf32>
    %53 = vector.broadcast %10 : vector<1x32xf32> to vector<16x32xf32>
    %54 = arith.mulf %52, %53 : vector<16x32xf32>
    %55 = vector.broadcast %11 : vector<1x32xf32> to vector<16x32xf32>
    %56 = arith.addf %54, %55 : vector<16x32xf32>
    %cst_18 = arith.constant dense<0.000000e+00> : vector<16x64xf32>
    %57 = tpu.matmul %56, %3, %cst_18 {dimension_numbers = #tpu.dot_dimension_numbers<[1], [0], [0], [1], [0, 0, 1, 1], [], []>} : vector<16x32xf32>, vector<32x64xf32>, vector<16x64xf32> -> vector<16x64xf32>
    %58 = vector.broadcast %8 : vector<1x64xf32> to vector<16x64xf32>
    %59 = arith.addf %57, %58 : vector<16x64xf32>
    %cst_19 = arith.constant dense<0.000000e+00> : vector<16x32xf32>
    %60 = tpu.matmul %59, %4, %cst_19 {dimension_numbers = #tpu.dot_dimension_numbers<[1], [0], [0], [1], [0, 0, 1, 1], [], []>} : vector<16x64xf32>, vector<64x32xf32>, vector<16x32xf32> -> vector<16x32xf32>
    %61 = vector.broadcast %9 : vector<1x32xf32> to vector<16x32xf32>
    %62 = arith.addf %60, %61 : vector<16x32xf32>
    %63 = arith.addf %62, %56 : vector<16x32xf32>
    %cst_20 = arith.constant dense<0.000000e+00> : vector<16xf32>
    %64 = vector.multi_reduction <add>, %63, %cst_20 [1] : vector<16x32xf32> to vector<16xf32>
    %65 = vector.shape_cast %64 : vector<16xf32> to vector<16x1xf32>
    %cst_21 = arith.constant 3.200000e+01 : f32
    %66 = vector.broadcast %cst_21 : f32 to vector<16x1xf32>
    %67 = arith.divf %65, %66 : vector<16x1xf32>
    %68 = arith.mulf %63, %63 : vector<16x32xf32>
    %cst_22 = arith.constant dense<0.000000e+00> : vector<16xf32>
    %69 = vector.multi_reduction <add>, %68, %cst_22 [1] : vector<16x32xf32> to vector<16xf32>
    %70 = vector.shape_cast %69 : vector<16xf32> to vector<16x1xf32>
    %cst_23 = arith.constant 3.200000e+01 : f32
    %71 = vector.broadcast %cst_23 : f32 to vector<16x1xf32>
    %72 = arith.divf %70, %71 : vector<16x1xf32>
    %73 = arith.mulf %67, %67 : vector<16x1xf32>
    %74 = arith.subf %72, %73 : vector<16x1xf32>
    %75 = vector.broadcast %67 : vector<16x1xf32> to vector<16x32xf32>
    %76 = arith.subf %63, %75 : vector<16x32xf32>
    %cst_24 = arith.constant 9.99999996E-13 : f32
    %77 = vector.broadcast %cst_24 : f32 to vector<16x1xf32>
    %78 = arith.addf %74, %77 : vector<16x1xf32>
    %79 = math.rsqrt %78 : vector<16x1xf32>
    %80 = vector.broadcast %79 : vector<16x1xf32> to vector<16x32xf32>
    %81 = arith.mulf %76, %80 : vector<16x32xf32>
    %82 = vector.broadcast %12 : vector<1x32xf32> to vector<16x32xf32>
    %83 = arith.mulf %81, %82 : vector<16x32xf32>
    %84 = vector.broadcast %13 : vector<1x32xf32> to vector<16x32xf32>
    %85 = arith.addf %83, %84 : vector<16x32xf32>
    %c0_25 = arith.constant 0 : index
    %c0_26 = arith.constant 0 : index
    %86 = vector.load %arg3[%c0_25, %c0_26] : memref<16x32xf32, #tpu.memory_space<vmem>>, vector<16x32xf32>
    tpu.vector_store %arg3[%c0_25, %c0_26], %85 {strides = array<i32>} : memref<16x32xf32, #tpu.memory_space<vmem>>, vector<16x32xf32>,
    return
  }
}

</mosaic_0001>

<bundles_post_ra>
// kernel: tpu_custom_call.1
= control target key start
LH: loop header
LB: loop body
LE: loop exit
PB: predicated region body
PF: predicated region fallthrough
CT: control target
= control target key end

     0   :  { %vm48_vm0 = vcmask 261120   ;;  %s1149_s26 = smov 32   ;;  %s1426_s0 = inlined_call_operand.vmem [shape: f32[16,32], index: 0, kind: input, shape index: {}]   ;;  %s1427_s1 = inlined_call_operand.vmem [shape: f32[16,64], index: 1, kind: input, shape index: {}]   ;;  %s1428_s2 = inlined_call_operand.vmem [shape: f32[200,96], index: 2, kind: input, shape index: {}]   ;;  %s1429_s3 = inlined_call_operand.hbm [shape: f32[16,32], index: 3, kind: output, shape index: {}]  }
   0x1   :  { %v19_v0 = vld [vmem:[%s1428_s2] sm:$0xff]  ;;  %v20_v1 = vld [vmem:[%s1428_s2 + $0x8] sm:$0xff]  ;;  %v21_v2 = vld [vmem:[%s1428_s2 + $0x10] sm:$0xff] }
   0x2   :  { %v975_v3 = vpack.c.bf16 %v20_v1, %v19_v0  ;;  %v22_v4 = vld [vmem:[%s1428_s2 + $0x18] sm:$0xff]  ;;  %v1190_v5 = vld [vmem:[%s1426_s0] sm:$0xff]  ;;  %v1197_v7 = vld [vmem:[%s1428_s2 + $0x90] sm:$0xff] }
   0x3   :  { %v979_v6 = vpack.c.bf16 %v22_v4, %v21_v2  ;;  %885 = vmatprep.mubr.msk.f32.mxu1 %vm48_vm0, %v1190_v5  ;;  %v1202_v8 = vld [vmem:[%s1428_s2 + $0x80] sm:$0xff]  ;;  %142 = vrot.lane.b32.xlu1 %v1197_v7, %s1149_s26  ;;  %v1209_v9 = vld [vmem:[%s1428_s2 + $0x98] sm:$0xff]  ;;  %v1214_v10 = vld [vmem:[%s1428_s2 + $0x88] sm:$0xff] }
   0x4   :  { %976 = vmatprep.subr.bf16.mxu1 %v975_v3  ;;  %138 = vrot.lane.b32.xlu0 %v1202_v8, %s1149_s26 }
   0x5   :  { %978 = vmatpush3.bf16.msra.mxu1 %v975_v3 }
   0x6   :  { %980 = vmatprep.subr.bf16.mxu1 %v979_v6 }
   0x7   :  { %8 = vsyncpa [#allocation3], 0  ;;  %144 = vrot.lane.b32.xlu1 %v1209_v9, %s1149_s26  ;;  %v1220_v11 = vld [vmem:[%s1426_s0 + $0x8] sm:$0xff]  ;;  %v1231_v13 = vld [vmem:[%s1428_s2 + $0xa0] sm:$0xff]  ;;  %v44_v18 = vlaneseq  ;;  %s1150_s15 = smov 96   ;;  %s1151_s16 = smov 64   ;;  %v1007_v62 = vpack.c.bf16 %v1214_v10, %v1202_v8  ;;  %v1011_v63 = vpack.c.bf16 %v1209_v9, %v1197_v7 }
   0x8   :  { %140 = vrot.lane.b32.xlu0 %v1214_v10, %s1149_s26  ;;  %v1226_v12 = vld [vmem:[%s1428_s2 + $0xa8] sm:$0xff]  ;;  %v1240_v14 = vld [vmem:[%s1428_s2 + $0xb8] sm:$0xff]  ;;  %v1245_v15 = vld [vmem:[%s1428_s2 + $0xb0] sm:$0xff]  ;;  %vm323_vm2 = vcmask 523264  }
   0x9   :  { %982 = vmatpush3.bf16.msra.mxu1 %v979_v6  ;;  %v1249_v19 = vshrl.u32 %v44_v18, 7  ;;  %v1255_v23 = vld [vmem:[%s1428_s2 + $0xc0] sm:$0xff]  ;;  %vm1290_vm1 = vmpackc.low %vm48_vm0, %vm48_vm0  ;;  %1008 = vmatprep.subr.bf16.mxu0 %v1007_v62  ;;  %v18_v2 = vld [vmem:[%s1427_s1 + $0x8] sm:$0xff] }
   0xa   :  { %1010 = vmatpush3.bf16.msra.mxu0 %v1007_v62  ;;  %v17_v3 = vld [vmem:[%s1427_s1] sm:$0xff] }
   0xb   :  { %148 = vrot.lane.b32.xlu1 %v1226_v12, %s1149_s26  ;;  %v46_v22 = vsub.s32 0, %v1249_v19  ;;  %1012 = vmatprep.subr.bf16.mxu0 %v1011_v63 }
   0xc   :  { %886 = vmatmul.mubr.msk.f32.vlgmr.msra.gmra.mrb[0].mxu1 %vm48_vm0, %v1220_v11  ;;  %146 = vrot.lane.b32.xlu0 %v1231_v13, %s1149_s26 }
   0xd   :  { %v47_v26 = vrot.slane %v1255_v23, %v46_v22 }
   0xe   :  { %1014 = vmatpush3.bf16.msra.mxu0 %v1011_v63 }
   0xf   :  { %152 = vrot.lane.b32.xlu1 %v1240_v14, %s1149_s26 }
  0x10   :  { %150 = vrot.lane.b32.xlu0 %v1245_v15, %s1149_s26 }
  0x75   :  { %v143_v16 = vpop.permute.xlu1 %142 }
  0x76   :  { %v139_v17 = vpop.permute.xlu0 %138 }
  0x79   :  { %v145_v20 = vpop.permute.xlu1 %144 }
  0x7a   :  { %v141_v21 = vpop.permute.xlu0 %140 }
  0x7d   :  { %v149_v24 = vpop.permute.xlu1 %148 }
  0x7e   :  { %v147_v25 = vpop.permute.xlu0 %146 }
  0x81   :  { %v153_v31 = vpop.permute.xlu1 %152 }
  0x82   :  { %v151_v32 = vpop.permute.xlu0 %150 }
  0xdf   :  { %v887_v27 = vpop.f32.mrb[0].mxu1 }
  0xe0   :  { %v1258_v28 = vadd.f32 %v887_v27, %v47_v26  ;;  %v121_v29 = vpop.f32.mrb[1].mxu1 }
  0xe1   :  { %v1260_v30 = vadd.f32 %v121_v29, %v47_v26 }
  0xe2   :  { %v165_v33 = vmul.f32 %v145_v20, %v1258_v28  ;;  %v163_v34 = vmul.f32 %v141_v21, %v1258_v28  ;;  %v169_v37 = vmul.f32 %v153_v31, %v1258_v28  ;;  %v167_v38 = vmul.f32 %v149_v24, %v1258_v28 }
  0xe3   :  { %904 = vmatprep.mubr.msk.f32.mxu1 %vm48_vm0, %v1260_v30  ;;  %v164_v35 = vmul.f32 %v143_v16, %v1260_v30  ;;  %v162_v36 = vmul.f32 %v139_v17, %v1260_v30  ;;  %v168_v39 = vmul.f32 %v151_v32, %v1260_v30  ;;  %v166_v42 = vmul.f32 %v147_v25, %v1260_v30 }
  0xe4   :  { %v1015_v31 = vpack.c.bf16 %v1226_v12, %v1231_v13 }
  0xe5   :  { %v1074_v40 = vpack.i.bf16 %v165_v33, %v164_v35  ;;  %v1069_v41 = vpack.i.bf16 %v163_v34, %v162_v36  ;;  %v1084_v43 = vpack.i.bf16 %v169_v37, %v168_v39  ;;  %v1079_v44 = vpack.i.bf16 %v167_v38, %v166_v42 }
  0xe6   :  { %1016 = vmatprep.subr.bf16.mxu0 %v1015_v31  ;;  %v1019_v35 = vpack.c.bf16 %v1240_v14, %v1245_v15 }
  0xe7   :  { %1075 = vrot.lane.b32.xlu1 %v1074_v40, %s1150_s15  ;;  %1070 = vrot.lane.b32.xlu0 %v1069_v41, %s1150_s15 }
  0xe8   :  { %1018 = vmatpush3.bf16.msra.mxu0 %v1015_v31  ;;  %v32_v31 = vld [vmem:[%s1428_s2 + $0x68] sm:$0xff] }
  0xe9   :  { %1020 = vmatprep.subr.bf16.mxu0 %v1019_v35 }
  0xeb   :  { %1085 = vrot.lane.b32.xlu1 %v1084_v43, %s1150_s15  ;;  %1080 = vrot.lane.b32.xlu0 %v1079_v44, %s1150_s15 }
  0xec   :  { %1022 = vmatpush3.bf16.msra.mxu0 %v1019_v35 }
  0xef   :  { %172 = vrot.lane.b32.xlu1 %v1214_v10, %s1151_s16  ;;  %170 = vrot.lane.b32.xlu0 %v1202_v8, %s1151_s16 }
  0xf3   :  { %176 = vrot.lane.b32.xlu1 %v1209_v9, %s1151_s16  ;;  %174 = vrot.lane.b32.xlu0 %v1197_v7, %s1151_s16 }
  0xf7   :  { %180 = vrot.lane.b32.xlu1 %v1226_v12, %s1151_s16  ;;  %178 = vrot.lane.b32.xlu0 %v1231_v13, %s1151_s16 }
  0xfb   :  { %184 = vrot.lane.b32.xlu1 %v1240_v14, %s1151_s16  ;;  %182 = vrot.lane.b32.xlu0 %v1245_v15, %s1151_s16 }
 0x159   :  { %v1076_v45 = vpop.permute.xlu1 %1075  ;;  %v1071_v46 = vpop.permute.xlu0 %1070 }
 0x15a   :  { %v1078_v47 = vunpack.i.h.bf16 %v1076_v45  ;;  %v1077_v48 = vunpack.i.l.bf16 %v1076_v45  ;;  %v1073_v49 = vunpack.i.h.bf16 %v1071_v46  ;;  %v1072_v50 = vunpack.i.l.bf16 %v1071_v46 }
 0x15c   :  { %v983_v52 = vpack.c.bf16 %v1073_v49, %v1072_v50  ;;  %v989_v53 = vpack.c.bf16 %v1078_v47, %v1077_v48 }
 0x15d   :  { %v1081_v54 = vpop.permute.xlu0 %1080  ;;  %v1086_v58 = vpop.permute.xlu1 %1085 }
 0x15e   :  { %985 = vmatprep.subr.msk.bf16.mxu1 %vm1290_vm1, %v983_v52  ;;  %v1083_v55 = vunpack.i.h.bf16 %v1081_v54  ;;  %v1082_v56 = vunpack.i.l.bf16 %v1081_v54  ;;  %v1088_v59 = vunpack.i.h.bf16 %v1086_v58  ;;  %v1087_v60 = vunpack.i.l.bf16 %v1086_v58 }
 0x15f   :  { %988 = vmatpush3.bf16.xpose.msk.msra.mxu1 %vm1290_vm1, %v983_v52 }
 0x160   :  { %991 = vmatprep.subr.msk.bf16.mxu1 %vm1290_vm1, %v989_v53  ;;  %v995_v57 = vpack.c.bf16 %v1083_v55, %v1082_v56  ;;  %v1001_v61 = vpack.c.bf16 %v1088_v59, %v1087_v60 }
 0x161   :  { %v173_v0 = vpop.permute.xlu1 %172  ;;  %v171_v1 = vpop.permute.xlu0 %170 }
 0x162   :  { %v195_v32 = vmul.f32 %v173_v0, %v1258_v28  ;;  %v194_v33 = vmul.f32 %v171_v1, %v1260_v30 }
 0x164   :  { %v1089_v36 = vpack.i.bf16 %v195_v32, %v194_v33 }
 0x165   :  { %v177_v9 = vpop.permute.xlu1 %176  ;;  %v175_v16 = vpop.permute.xlu0 %174 }
 0x166   :  { %v197_v21 = vmul.f32 %v177_v9, %v1258_v28  ;;  %v196_v22 = vmul.f32 %v175_v16, %v1260_v30 }
 0x167   :  { %994 = vmatpush3.bf16.xpose.msk.msra.mxu1 %vm1290_vm1, %v989_v53 }
 0x168   :  { %997 = vmatprep.subr.msk.bf16.mxu1 %vm1290_vm1, %v995_v57  ;;  %v1094_v26 = vpack.i.bf16 %v197_v21, %v196_v22  ;;  %v27_v21 = vld [vmem:[%s1428_s2 + $0x40] sm:$0xff]  ;;  %v28_v22 = vld [vmem:[%s1428_s2 + $0x48] sm:$0xff] }
 0x169   :  { %v181_v18 = vpop.permute.xlu1 %180  ;;  %v179_v20 = vpop.permute.xlu0 %178 }
 0x16a   :  { %v199_v37 = vmul.f32 %v181_v18, %v1258_v28  ;;  %v198_v38 = vmul.f32 %v179_v20, %v1260_v30  ;;  %v26_v18 = vld [vmem:[%s1428_s2 + $0x38] sm:$0xff] }
 0x16c   :  { %v1099_v12 = vpack.i.bf16 %v199_v37, %v198_v38 }
 0x16d   :  { %v185_v24 = vpop.permute.xlu1 %184  ;;  %v183_v25 = vpop.permute.xlu0 %182 }
 0x16e   :  { %v201_v27 = vmul.f32 %v185_v24, %v1258_v28  ;;  %v200_v29 = vmul.f32 %v183_v25, %v1260_v30  ;;  %v29_v24 = vld [vmem:[%s1428_s2 + $0x50] sm:$0xff]  ;;  %v1047_v25 = vpack.c.bf16 %v28_v22, %v27_v21 }
 0x16f   :  { %1000 = vmatpush3.bf16.xpose.msk.msra.mxu1 %vm1290_vm1, %v995_v57 }
 0x170   :  { %1003 = vmatprep.subr.msk.bf16.mxu1 %vm1290_vm1, %v1001_v61  ;;  %v1104_v34 = vpack.i.bf16 %v201_v27, %v200_v29  ;;  %v31_v29 = vld [vmem:[%s1428_s2 + $0x60] sm:$0xff] }
 0x171   :  { %v1055_v32 = vpack.c.bf16 %v32_v31, %v31_v29 }
 0x177   :  { %1006 = vmatpush3.bf16.xpose.msk.msra.mxu1 %vm1290_vm1, %v1001_v61 }
 0x17e   :  { %905 = vmatmul.mubr.msk.f32.vlgmr.msra.gmra.mrb[2].mxu1 %vm48_vm0, %v1258_v28 }
 0x251   :  { %v906_v4 = vpop.f32.mrb[2].mxu1 }
 0x252   :  { %v320_v6 = vadd.f32 %v906_v4, %v18_v2  ;;  %v314_v8 = vpop.f32.mrb[3].mxu1 }
 0x253   :  { %v315_v10 = vadd.f32 %v314_v8, %v17_v3 }
 0x254   :  { %v327_v7 = vsel %vm323_vm2, %v320_v6, -inf }
 0x255   :  { %328 = vmax.xlane.f32.xlu1 %v327_v7  ;;  %v324_v17 = vsel %vm323_vm2, %v315_v10, -inf }
 0x256   :  { %325 = vmax.xlane.f32.xlu0 %v324_v17  ;;  %v25_v17 = vld [vmem:[%s1428_s2 + $0x30] sm:$0xff] }
 0x257   :  { %v1043_v20 = vpack.c.bf16 %v26_v18, %v25_v17 }
 0x266   :  { %1095 = vrot.lane.b32.xlu1 %v1094_v26, %s1151_s16  ;;  %v30_v26 = vld [vmem:[%s1428_s2 + $0x58] sm:$0xff] }
 0x267   :  { %v1051_v27 = vpack.c.bf16 %v30_v26, %v29_v24 }
 0x26a   :  { %1105 = vrot.lane.b32.xlu1 %v1104_v34, %s1151_s16 }
 0x26c   :  { %1090 = vrot.lane.b32.xlu0 %v1089_v36, %s1151_s16 }
 0x270   :  { %1100 = vrot.lane.b32.xlu0 %v1099_v12, %s1151_s16 }
 0x2e2   :  { %v329_v13 = vpop.xlane.xlu1 %328 }
 0x2e3   :  { %v331_v39 = vsub.f32 %v320_v6, %v329_v13  ;;  %v326_v40 = vpop.xlane.xlu0 %325 }
 0x2e4   :  { %v330_v41 = vsub.f32 %v315_v10, %v326_v40 }
 0x2e5   :  { %v334_v42 = vmul.f32 1.442695, %v331_v39 }
 0x2e6   :  { %v332_v14 = vmul.f32 1.442695, %v330_v41  ;;  %v1096_v44 = vpop.permute.xlu1 %1095 }
 0x2e7   :  { %v1091_v15 = vpop.permute.xlu0 %1090  ;;  %v1098_v45 = vunpack.i.h.bf16 %v1096_v44  ;;  %v1097_v46 = vunpack.i.l.bf16 %v1096_v44 }
 0x2e8   :  { %1109 = vpow2.f32 %v332_v14  ;;  %v1093_v28 = vunpack.i.h.bf16 %v1091_v15  ;;  %v1092_v43 = vunpack.i.l.bf16 %v1091_v15 }
 0x2e9   :  { %1111 = vpow2.f32 %v334_v42  ;;  %v1027_v50 = vpack.c.bf16 %v1098_v45, %v1097_v46 }
 0x2ea   :  { %v1023_v30 = vpack.c.bf16 %v1093_v28, %v1092_v43  ;;  %v1106_v53 = vpop.permute.xlu1 %1105  ;;  %v563_v28 = vsub.s32 3, %v1249_v19  ;;  %v569_v43 = vsub.s32 4, %v1249_v19 }
 0x2eb   :  { %v1101_v47 = vpop.permute.xlu0 %1100  ;;  %v1108_v54 = vunpack.i.h.bf16 %v1106_v53  ;;  %v1107_v55 = vunpack.i.l.bf16 %v1106_v53 }
 0x2ec   :  { %1024 = vmatprep.subr.bf16.mxu0 %v1023_v30  ;;  %v1103_v51 = vunpack.i.h.bf16 %v1101_v47  ;;  %v1102_v52 = vunpack.i.l.bf16 %v1101_v47  ;;  %v564_v44 = vrot.slane %v1255_v23, %v563_v28  ;;  %v570_v47 = vrot.slane %v1255_v23, %v569_v43 }
 0x2ed   :  { %v1035_v57 = vpack.c.bf16 %v1108_v54, %v1107_v55  ;;  %v33_v55 = vld [vmem:[%s1428_s2 + $0x70] sm:$0xff] }
 0x2ee   :  { %v1031_v56 = vpack.c.bf16 %v1103_v51, %v1102_v52 }
 0x2f2   :  { %v1110_v48 = vpop.eup %1109 }
 0x2f3   :  { %v1112_v49 = vpop.eup %1111  ;;  %923 = vmatprep.mubr.msk.f32.mxu0 %vm323_vm2, %v1110_v48 }
 0x2f4   :  { %924 = vmatmul.mubr.msk.f32.vlgmr.msra.gmra.mrb[0].mxu0 %vm323_vm2, %v1112_v49 }
 0x2f5   :  { %1026 = vmatpush3.bf16.msra.mxu0 %v1023_v30  ;;  %942 = vmatprep.mubr.msk.f32.mxu0 %vm323_vm2, %v1110_v48 }
 0x2f6   :  { %1028 = vmatprep.subr.bf16.mxu0 %v1027_v50 }
 0x2f9   :  { %1030 = vmatpush3.bf16.msra.mxu0 %v1027_v50 }
 0x2fa   :  { %1032 = vmatprep.subr.bf16.mxu0 %v1031_v56 }
 0x2fd   :  { %1034 = vmatpush3.bf16.msra.mxu0 %v1031_v56  ;;  %v34_v56 = vld [vmem:[%s1428_s2 + $0x78] sm:$0xff] }
 0x2fe   :  { %1036 = vmatprep.subr.bf16.mxu0 %v1035_v57 }
 0x301   :  { %1038 = vmatpush3.bf16.msra.mxu0 %v1035_v57  ;;  %v1059_v57 = vpack.c.bf16 %v34_v56, %v33_v55 }
 0x302   :  { %1048 = vmatprep.subr.bf16.mxu0 %v1047_v25 }
 0x304   :  { %943 = vmatmul.mubr.msk.f32.vlgmr.msra.gmra.mrb[2].mxu0 %vm323_vm2, %v1112_v49 }
 0x305   :  { %1050 = vmatpush3.bf16.msra.mxu0 %v1047_v25 }
 0x306   :  { %1052 = vmatprep.subr.bf16.mxu0 %v1051_v27 }
 0x309   :  { %1054 = vmatpush3.bf16.msra.mxu0 %v1051_v27 }
 0x30a   :  { %1056 = vmatprep.subr.bf16.mxu0 %v1055_v32 }
 0x30d   :  { %1058 = vmatpush3.bf16.msra.mxu0 %v1055_v32 }
 0x30e   :  { %1060 = vmatprep.subr.bf16.mxu0 %v1059_v57 }
 0x311   :  { %1062 = vmatpush3.bf16.msra.mxu0 %v1059_v57 }
 0x3c7   :  { %v925_v58 = vpop.f32.mrb[0].mxu0 }
 0x3c8   :  { %v408_v59 = vpop.f32.mrb[1].mxu0  ;;  %1113 = vrcp.f32 %v925_v58  ;;  %v575_v58 = vsub.s32 1, %v1249_v19 }
 0x3c9   :  { %1115 = vrcp.f32 %v408_v59 }
 0x3ca   :  { %v576_v59 = vrot.slane %v1255_v23, %v575_v58 }
 0x3d2   :  { %v1114_v60 = vpop.eup %1113 }
 0x3d3   :  { %v1116_v62 = vpop.eup %1115 }
 0x3d7   :  { %v944_v61 = vpop.f32.mrb[2].mxu0 }
 0x3d8   :  { %v527_v63 = vmul.f32 %v1114_v60, %v944_v61  ;;  %v515_v0 = vpop.f32.mrb[3].mxu0 }
 0x3d9   :  { %v525_v1 = vmul.f32 %v1116_v62, %v515_v0  ;;  %v660_v0 = vsub.s32 2, %v1249_v19 }
 0x3da   :  { %v1345_v2 = vadd.f32 %v527_v63, %v1220_v11  ;;  %v24_v11 = vld [vmem:[%s1428_s2 + $0x28] sm:$0xff] }
 0x3db   :  { %v528_v3 = vadd.f32 %v525_v1, %v1190_v5  ;;  %v23_v5 = vld [vmem:[%s1428_s2 + $0x20] sm:$0xff]  ;;  %v661_v1 = vrot.slane %v1255_v23, %v660_v0  ;;  %s1152_s2 = smov [#allocation2]  }
 0x3dc   :  { %v533_v4 = vsel %vm48_vm0, %v1345_v2, 0.0  ;;  %v540_v7 = vmul.f32 %v1345_v2, %v1345_v2  ;;  %v1039_v16 = vpack.c.bf16 %v24_v11, %v23_v5  ;;  %s794_s16 = sshll.u32 %s1152_s2, 4  ;;  %s795_s16 = int_to_ptr.vmem [resolvable:$true] %s794_s16 }
 0x3dd   :  { %534 = vadd.xlane.f32.xlu1 %v533_v4  ;;  %v530_v6 = vsel %vm48_vm0, %v528_v3, 0.0  ;;  %v539_v8 = vmul.f32 %v528_v3, %v528_v3  ;;  %s1125_s17 = scalar_lea.vmem %s795_s16, 256  ;;  %p1130_p1 = scmp.lt.s32.totalorder %s795_s16, %s795_s16 }
 0x3de   :  { %531 = vadd.xlane.f32.xlu0 %v530_v6  ;;  %v544_v9 = vsel %vm48_vm0, %v540_v7, 0.0  ;;  %1040 = vmatprep.subr.bf16.mxu1 %v1039_v16  ;;  %p1126_p0 = scmp.ne.s32.totalorder %s795_s16, %s1125_s17  ;;  %p1131_p2 = scmp.lt.s32.totalorder %s1125_s17, %s1125_s17 }
 0x3df   :  { %v541_v10 = vsel %vm48_vm0, %v539_v8, 0.0  ;;  %1042 = vmatpush3.bf16.msra.mxu1 %v1039_v16 }
 0x3e0   :  { %1044 = vmatprep.subr.bf16.mxu1 %v1043_v20  ;;  %p1132_p3 = por %p1131_p2, %p1130_p1 }
 0x3e2   :  { %542 = vadd.xlane.f32.xlu0 %v541_v10  ;;  %p1133_p4 = pnand %p1132_p3, %p1126_p0 }
 0x3e3   :  { %1046 = vmatpush3.bf16.msra.mxu1 %v1043_v20 }
 0x3e6   :  { %545 = vadd.xlane.f32.xlu0 %v544_v9 }
 0x46a   :  { %v535_v35 = vpop.xlane.xlu1 %534 }
 0x46b   :  { %v532_v33 = vpop.xlane.xlu0 %531  ;;  %v538_v37 = vmul.f32 0.03125, %v535_v35 }
 0x46c   :  { %v537_v34 = vmul.f32 0.03125, %v532_v33 }
 0x46d   :  { %v550_v40 = vmul.f32 %v538_v37, %v538_v37  ;;  %v554_v48 = vsub.f32 %v1345_v2, %v538_v37  ;;  %v783_v37 = vsub.s32 6, %v1249_v19 }
 0x46e   :  { %v549_v38 = vmul.f32 %v537_v34, %v537_v34  ;;  %v553_v30 = vsub.f32 %v528_v3, %v537_v34 }
 0x46f   :  { %v543_v36 = vpop.xlane.xlu0 %542 }
 0x470   :  { %v547_v12 = vmul.f32 0.03125, %v543_v36  ;;  %v777_v36 = vsub.s32 5, %v1249_v19 }
 0x472   :  { %v551_v13 = vsub.f32 %v547_v12, %v549_v38  ;;  %v778_v12 = vrot.slane %v1255_v23, %v777_v36 }
 0x473   :  { %v546_v39 = vpop.xlane.xlu0 %545 }
 0x474   :  { %v555_v41 = vadd.f32 1e-12, %v551_v13  ;;  %v548_v42 = vmul.f32 0.03125, %v546_v39 }
 0x476   :  { %1117 = vrsqrt.f32 %v555_v41  ;;  %v552_v14 = vsub.f32 %v548_v42, %v550_v40  ;;  %v784_v42 = vrot.slane %v1255_v23, %v783_v37 }
 0x478   :  { %v556_v15 = vadd.f32 1e-12, %v552_v14 }
 0x47a   :  { %1119 = vrsqrt.f32 %v556_v15 }
 0x480   :  { %v1118_v45 = vpop.eup %1117 }
 0x481   :  { %v559_v46 = vmul.f32 %v1118_v45, %v553_v30 }
 0x483   :  { %v565_v49 = vmul.f32 %v564_v44, %v559_v46 }
 0x484   :  { %v1120_v50 = vpop.eup %1119 }
 0x485   :  { %v560_v51 = vmul.f32 %v1120_v50, %v554_v48  ;;  %v571_v52 = vadd.f32 %v570_v47, %v565_v49 }
 0x487   :  { %v566_v53 = vmul.f32 %v564_v44, %v560_v51  ;;  %953 = vmatprep.mubr.msk.f32.mxu1 %vm48_vm0, %v571_v52 }
 0x489   :  { %v572_v54 = vadd.f32 %v570_v47, %v566_v53 }
 0x48b   :  { %954 = vmatmul.mubr.msk.f32.vlgmr.msra.gmra.mrb[4].mxu1 %vm48_vm0, %v572_v54 }
 0x55e   :  { %v955_v60 = vpop.f32.mrb[4].mxu1 }
 0x55f   :  { %v649_v61 = vpop.f32.mrb[5].mxu1  ;;  %v655_v63 = vadd.f32 %v955_v60, %v576_v59 }
 0x560   :  { %v650_v62 = vadd.f32 %v649_v61, %v576_v59 }
 0x562   :  { %972 = vmatprep.mubr.msk.f32.mxu0 %vm323_vm2, %v650_v62 }
 0x563   :  { %973 = vmatmul.mubr.msk.f32.vlgmr.msra.gmra.mrb[4].mxu0 %vm323_vm2, %v655_v63 }
 0x636   :  { %v974_v2 = vpop.f32.mrb[4].mxu0 }
 0x637   :  { %v740_v3 = vadd.f32 %v974_v2, %v661_v1  ;;  %v734_v4 = vpop.f32.mrb[5].mxu0 }
 0x638   :  { %v735_v6 = vadd.f32 %v734_v4, %v661_v1 }
 0x639   :  { %v744_v8 = vadd.f32 %v740_v3, %v572_v54 }
 0x63a   :  { %v743_v10 = vadd.f32 %v735_v6, %v571_v52 }
 0x63b   :  { %v748_v7 = vsel %vm48_vm0, %v744_v8, 0.0  ;;  %v754_v9 = vmul.f32 %v744_v8, %v744_v8 }
 0x63c   :  { %749 = vadd.xlane.f32.xlu0 %v748_v7  ;;  %v745_v5 = vsel %vm48_vm0, %v743_v10, 0.0  ;;  %v753_v11 = vmul.f32 %v743_v10, %v743_v10 }
 0x63d   :  { %746 = vadd.xlane.f32.xlu1 %v745_v5  ;;  %v758_v16 = vsel %vm48_vm0, %v754_v9, 0.0 }
 0x63e   :  { %v755_v17 = vsel %vm48_vm0, %v753_v11, 0.0 }
 0x640   :  { %759 = vadd.xlane.f32.xlu0 %v758_v16 }
 0x641   :  { %756 = vadd.xlane.f32.xlu1 %v755_v17 }
 0x6c9   :  { %v750_v18 = vpop.xlane.xlu0 %749 }
 0x6ca   :  { %v752_v20 = vmul.f32 0.03125, %v750_v18  ;;  %v747_v21 = vpop.xlane.xlu1 %746 }
 0x6cb   :  { %v751_v22 = vmul.f32 0.03125, %v747_v21 }
 0x6cc   :  { %v764_v25 = vmul.f32 %v752_v20, %v752_v20  ;;  %v768_v38 = vsub.f32 %v744_v8, %v752_v20 }
 0x6cd   :  { %v760_v24 = vpop.xlane.xlu0 %759  ;;  %v763_v29 = vmul.f32 %v751_v22, %v751_v22  ;;  %v767_v39 = vsub.f32 %v743_v10, %v751_v22 }
 0x6ce   :  { %v762_v26 = vmul.f32 0.03125, %v760_v24  ;;  %v757_v27 = vpop.xlane.xlu1 %756 }
 0x6cf   :  { %v761_v31 = vmul.f32 0.03125, %v757_v27 }
 0x6d0   :  { %v766_v32 = vsub.f32 %v762_v26, %v764_v25 }
 0x6d1   :  { %v765_v33 = vsub.f32 %v761_v31, %v763_v29 }
 0x6d2   :  { %v770_v34 = vadd.f32 1e-12, %v766_v32 }
 0x6d3   :  { %v769_v35 = vadd.f32 1e-12, %v765_v33 }
 0x6d4   :  { %1121 = vrsqrt.f32 %v770_v34 }
 0x6d5   :  { %1123 = vrsqrt.f32 %v769_v35 }
 0x6de   :  { %v1122_v13 = vpop.eup %1121 }
 0x6df   :  { %v1124_v40 = vpop.eup %1123  ;;  %v774_v41 = vmul.f32 %v1122_v13, %v768_v38 }
 0x6e0   :  { %v773_v14 = vmul.f32 %v1124_v40, %v767_v39 }
 0x6e1   :  { %v780_v15 = vmul.f32 %v778_v12, %v774_v41 }
 0x6e2   :  { %v779_v28 = vmul.f32 %v778_v12, %v773_v14 }
 0x6e3   :  { %v786_v43 = vadd.f32 %v784_v42, %v780_v15 }
 0x6e4   :  { %v785_v30 = vadd.f32 %v784_v42, %v779_v28 }
 0x6e5   :  { %788 = vst.msk [vmem:[#allocation2 + $0x8] sm:$0xff] %vm48_vm0, %v786_v43 }
 0x6e6   :  { %787 = vst.msk [vmem:[#allocation2] sm:$0xff] %vm48_vm0, %v785_v30 }
 0x6e7   :  { %1136 = shalt.err (!%p1133_p4)
}
 0x6e8   :  { %s1137_s20 = scalar_lea.hbm %s1429_s3, 256 }
 0x6e9   :  { %p1138_p5 = scmp.ne.s32.totalorder %s1429_s3, %s1137_s20  ;;  %p1141_p6 = scmp.lt.u32.totalorder %s1137_s20, %s1429_s3 }
 0x6eb   :  { %p1143_p7 = pnand %p1141_p6, %p1138_p5 }
 0x6ed   :  { %1146 = shalt.err (!%p1143_p7)
}
 0x6ee   :  { %s1153_s24 = smov 128   ;;  %s1154_s25 = smov 8  }
 0x6ef   :  { %800 = dma.vmem_to_hbm [thread:$0]  %s795_s16, 256, %s1429_s3, [#allocation3], %s1153_s24, %s1153_s24, %s1154_s25  }
 0x6f0   :  { %1147 = dma.done.wait [#allocation3], 256  }
 0x6f1   :  { %1148 = vsyncadd [#allocation3], 4294967040 }
 0x6f2   :  { %804 = vsyncpa [#allocation3], 1 }

</bundles_post_ra>
